<compile_context>
chip_gen: v7x
topology: tpu7x:2x2x1
jax: 0.10.0
libtpu: 0.0.40
codegen_flags: <defaults>
</compile_context>

<pallas_src>
import functools

import numpy as np
import jax
import jax.numpy as jnp
from jax.experimental import pallas as pl
from jax.experimental.pallas import tpu as pltpu


def _round_up(x, m):
    return ((x + m - 1) // m) * m


def _charconv_kernel(idp_ref, emb_ref, wcat_ref, bconv_ref, wlin_ref, blin_ref,
                     o_ref, *, W, FS):
    """One tile of rows: in-kernel gather + fused conv + max + tanh + skip."""
    TN, WpA, _ = idp_ref.shape
    VSZ, D = emb_ref.shape
    H = wcat_ref.shape[1]

    ids3 = idp_ref[...]                                          # (TN, WpA, 1) int32

    # --- embedding gather, in-kernel ------------------------------------
    # one-hot (lanes = vocab) x (VSZ, D) bf16 table on the MXU; -1 halo /
    # padding ids match no vocab row -> exact zero rows (conv zero padding).
    vocab_iota = jax.lax.broadcasted_iota(jnp.int32, (TN, WpA, VSZ), 2)
    onehot = jnp.where(ids3 == vocab_iota, 1.0, 0.0)             # (TN, WpA, VSZ) f32
    onehot2 = onehot.reshape(TN * WpA, VSZ).astype(jnp.bfloat16)
    xpad = jnp.dot(onehot2, emb_ref[...],
                   preferred_element_type=jnp.float32)           # (TN*WpA, D) f32
    xpad = xpad.reshape(TN, WpA, D)

    # --- Conv1d(D->H, FS, padding=FS//2) as ONE im2col matmul ------------
    # xcat[:, t, k*D:(k+1)*D] = xpad[:, t+k, :]; values are bf16-representable
    # (gathered bf16 table entries), so the bf16 cast is lossless.
    xcat = jnp.concatenate([xpad[:, k:k + W, :] for k in range(FS)], axis=2)
    xcat2 = xcat.reshape(TN * W, FS * D).astype(jnp.bfloat16)
    acc = jnp.dot(xcat2, wcat_ref[...],
                  preferred_element_type=jnp.float32)            # (TN*W, H) f32
    acc = acc.reshape(TN, W, H)

    # --- max-over-time, THEN bias + tanh (monotone => same result, W x fewer
    # transcendentals / bias adds) ----------------------------------------
    mots = jnp.tanh(jnp.max(acc, axis=1) + bconv_ref[...])       # (TN, H) f32

    # --- SkipConnection: x + relu(Linear(x)), all f32 --------------------
    proj = jnp.dot(mots, wlin_ref[...].astype(jnp.float32),
                   preferred_element_type=jnp.float32) + blin_ref[...]
    gated = mots + jnp.maximum(proj, 0.0)

    # TODO(synk): train-mode dropout (ParallelConv.conv_drop) not implemented;
    # eval-mode identity only.
    # NOTE(perf review #7): H=32 < 128 lanes => masked vst on the output, but
    # the store slot is far from binding here (output bytes per grid step are
    # tiny vs. the two MXU matmuls), so the lane-dense (tile_n/4, 4*H) reshape
    # trick is intentionally skipped.
    o_ref[...] = gated.astype(o_ref.dtype)


def char_conv_embed(xch, emb_table, wconv_t, bconv, wlin_t, blin, *, tile_n=256):
    """CharConvEmbeddings forward (eval mode).

    xch:       (B, T, W) int32 char ids
    emb_table: (VSZ, D)  f32 embedding table (row 0 = padding_idx)
    wconv_t:   (H, D, FS) f32 Conv1d weight (torch O,I,K layout)
    bconv:     (H,)       f32 Conv1d bias
    wlin_t:    (H, H)     f32 Linear weight (torch out,in layout)
    blin:      (H,)       f32 Linear bias
    Returns (B, T, H) f32.
    """
    B, T, W = xch.shape
    VSZ, D = emb_table.shape
    H, _, FS = wconv_t.shape
    assert FS % 2 == 1, "padding=FS//2 only preserves width for odd filter sizes"
    pad = FS // 2
    Wp = W + 2 * pad
    WpA = _round_up(Wp, 8)          # 8-align so in-kernel reshapes are layout-trivial
    N = B * T

    # Tile sizing: big tiles amortize the ~0.35us per-grid-step overhead, but
    # keep >= ~8 grid steps so v7x's two TensorCores both get work and each
    # still pipelines DMA against compute.  tile_n is tunable (256..1024).
    tile_n = max(8, min(int(tile_n), _round_up(pl.cdiv(N, 8), 8)))
    Np = _round_up(N, tile_n)

    # ids, padded with -1: halo columns give true conv zero-padding in-kernel,
    # dummy rows (ragged N) are finite garbage sliced off below.  Trailing unit
    # dim keeps the vocab-compare a cheap lane broadcast inside the kernel.
    ids = xch.reshape(N, W).astype(jnp.int32)
    idp = jnp.pad(ids, ((0, Np - N), (pad, WpA - W - pad)), constant_values=-1)
    idp = idp[:, :, None]                                        # (Np, WpA, 1)

    # bf16 parameters for the MXU (halves DMA bytes, 2x matmul throughput);
    # all epilogue math stays in f32.
    emb_bf = emb_table.astype(jnp.bfloat16)                               # (VSZ, D)
    wcat_bf = jnp.transpose(wconv_t, (2, 1, 0)).reshape(FS * D, H).astype(jnp.bfloat16)
    wlin_bf = wlin_t.T.astype(jnp.bfloat16)                               # y = x @ W^T + b
    bconv2 = bconv.reshape(1, H).astype(jnp.float32)
    blin2 = blin.reshape(1, H).astype(jnp.float32)

    kernel = functools.partial(_charconv_kernel, W=W, FS=FS)
    out = pl.pallas_call(
        kernel,
        out_shape=jax.ShapeDtypeStruct((Np, H), jnp.float32),
        grid_spec=pltpu.PrefetchScalarGridSpec(
            num_scalar_prefetch=0,
            grid=(Np // tile_n,),
            in_specs=[
                pl.BlockSpec((tile_n, WpA, 1), lambda i: (i, 0, 0)),  # char ids
                pl.BlockSpec((VSZ, D), lambda i: (0, 0)),             # emb table (VMEM resident)
                pl.BlockSpec((FS * D, H), lambda i: (0, 0)),          # fused conv weight
                pl.BlockSpec((1, H), lambda i: (0, 0)),               # conv bias
                pl.BlockSpec((H, H), lambda i: (0, 0)),               # skip linear W^T
                pl.BlockSpec((1, H), lambda i: (0, 0)),               # skip linear bias
            ],
            out_specs=pl.BlockSpec((tile_n, H), lambda i: (i, 0)),
        ),
        compiler_params=pltpu.CompilerParams(
            dimension_semantics=("parallel",),
            vmem_limit_bytes=32 * 1024 * 1024),
    )(idp, emb_bf, wcat_bf, bconv2, wlin_bf, blin2)
    return out[:N].reshape(B, T, H)


def reference(xch, emb, wconv_t, bconv, wlin_t, blin):
    """Pure-JAX reference mirroring the PyTorch forward (eval mode)."""
    B, T, Wc = xch.shape
    H, _, FS = wconv_t.shape
    ce = jnp.take(emb, xch.reshape(-1, Wc), axis=0)              # (N, W, D)
    x_ncw = jnp.transpose(ce, (0, 2, 1))                         # (N, D, W) like torch
    y = jax.lax.conv_general_dilated(
        x_ncw, wconv_t, window_strides=(1,), padding=[(FS // 2, FS // 2)],
        dimension_numbers=("NCH", "OIH", "NCH"))
    act = jnp.tanh(y + bconv[None, :, None])
    mots = jnp.max(act, axis=2)                                  # (N, H)
    gated = mots + jax.nn.relu(mots @ wlin_t.T + blin)
    return gated.reshape(B, T, H)


if __name__ == "__main__":
    B, T, W = 2, 8, 16                  # batch, word-seq length, chars per word
    VSZ, DSZ, HSZ, FS = 50, 32, 32, 3   # char vocab, char dsz, wsz (conv hidden), cfiltsz=[3]

    key = jax.random.PRNGKey(0)
    k1, k2, k3, k4, k5, k6 = jax.random.split(key, 6)

    def bf16_round(x):  # params are bf16-representable so kernel/reference see identical values
        return x.astype(jnp.bfloat16).astype(jnp.float32)

    emb = bf16_round(jax.random.normal(k1, (VSZ, DSZ), jnp.float32) * 0.1)
    emb = emb.at[0].set(0.0)                                     # padding_idx=0 row
    wconv_t = bf16_round(jax.random.normal(k2, (HSZ, DSZ, FS), jnp.float32) * 0.1)
    bconv = jax.random.normal(k3, (HSZ,), jnp.float32) * 0.1
    wlin_t = bf16_round(jax.random.normal(k4, (HSZ, HSZ), jnp.float32) * 0.1)
    blin = jax.random.normal(k5, (HSZ,), jnp.float32) * 0.1

    xch = jax.random.randint(k6, (B, T, W), 0, VSZ, jnp.int32)

    out = char_conv_embed(xch, emb, wconv_t, bconv, wlin_t, blin, tile_n=256)
    out = jax.block_until_ready(out)

    ref = reference(xch, emb, wconv_t, bconv, wlin_t, blin)
    np.testing.assert_allclose(np.asarray(out), np.asarray(ref),
                               rtol=5e-3, atol=5e-3)
    print("KERNEL_OK")
</pallas_src>

<mosaic_0001>
module attributes {stable_mosaic.version = 11 : i64} {
  func.func @_charconv_kernel(%arg0: i32, %arg1: memref<8x24x1xi32, #tpu.memory_space<vmem>>, %arg2: memref<50x32xbf16, #tpu.memory_space<vmem>>, %arg3: memref<96x32xbf16, #tpu.memory_space<vmem>>, %arg4: memref<1x32xf32, #tpu.memory_space<vmem>>, %arg5: memref<32x32xbf16, #tpu.memory_space<vmem>>, %arg6: memref<1x32xf32, #tpu.memory_space<vmem>>, %arg7: memref<8x32xf32, #tpu.memory_space<vmem>>) attributes {dimension_semantics = [#tpu.dimension_semantics<parallel>], iteration_bounds = array<i64: 2>, scalar_prefetch = 0 : i64, scratch_operands = 0 : i64, tpu.core_type = #tpu.core_type<tc>, window_params = [{transform_indices = @transform_0, window_bounds = array<i64: 8, 24, 1>}, {pipeline_mode = #tpu.pipeline_mode<synchronous>, transform_indices = @transform_1, window_bounds = array<i64: 50, 32>}, {pipeline_mode = #tpu.pipeline_mode<synchronous>, transform_indices = @transform_2, window_bounds = array<i64: 96, 32>}, {pipeline_mode = #tpu.pipeline_mode<synchronous>, transform_indices = @transform_3, window_bounds = array<i64: 1, 32>}, {pipeline_mode = #tpu.pipeline_mode<synchronous>, transform_indices = @transform_4, window_bounds = array<i64: 32, 32>}, {pipeline_mode = #tpu.pipeline_mode<synchronous>, transform_indices = @transform_5, window_bounds = array<i64: 1, 32>}, {transform_indices = @transform_6, window_bounds = array<i64: 8, 32>}]} {
    %c0 = arith.constant 0 : index
    %c0_0 = arith.constant 0 : index
    %c0_1 = arith.constant 0 : index
    %0 = vector.load %arg1[%c0, %c0_0, %c0_1] : memref<8x24x1xi32, #tpu.memory_space<vmem>>, vector<8x24x1xi32>
    %1 = tpu.iota {dimensions = array<i32: 2>} : vector<8x24x50xi32>
    %2 = vector.broadcast %0 : vector<8x24x1xi32> to vector<8x24x50xi32>
    %3 = arith.cmpi eq, %2, %1 : vector<8x24x50xi32>
    %cst = arith.constant 1.000000e+00 : f32
    %cst_2 = arith.constant 0.000000e+00 : f32
    %4 = vector.broadcast %cst : f32 to vector<8x24x50xf32>
    %5 = vector.broadcast %cst_2 : f32 to vector<8x24x50xf32>
    %6 = arith.select %3, %4, %5 : vector<8x24x50xi1>, vector<8x24x50xf32>
    %7 = vector.shape_cast %6 : vector<8x24x50xf32> to vector<192x50xf32>
    %8 = arith.truncf %7 : vector<192x50xf32> to vector<192x50xbf16>
    %c0_3 = arith.constant 0 : index
    %c0_4 = arith.constant 0 : index
    %9 = vector.load %arg2[%c0_3, %c0_4] : memref<50x32xbf16, #tpu.memory_space<vmem>>, vector<50x32xbf16>
    %cst_5 = arith.constant dense<0.000000e+00> : vector<192x32xf32>
    %10 = tpu.matmul %8, %9, %cst_5 {dimension_numbers = #tpu.dot_dimension_numbers<[1], [0], [0], [1], [0, 0, 1, 1], [], []>} : vector<192x50xbf16>, vector<50x32xbf16>, vector<192x32xf32> -> vector<192x32xf32>
    %11 = vector.shape_cast %10 : vector<192x32xf32> to vector<8x24x32xf32>
    %12 = vector.extract_strided_slice %11 {offsets = [0, 0, 0], sizes = [8, 16, 32], strides = [1, 1, 1]} : vector<8x24x32xf32> to vector<8x16x32xf32>
    %13 = vector.extract_strided_slice %11 {offsets = [0, 1, 0], sizes = [8, 16, 32], strides = [1, 1, 1]} : vector<8x24x32xf32> to vector<8x16x32xf32>
    %14 = vector.extract_strided_slice %11 {offsets = [0, 2, 0], sizes = [8, 16, 32], strides = [1, 1, 1]} : vector<8x24x32xf32> to vector<8x16x32xf32>
    %15 = tpu.concatenate %12, %13, %14 in 2 : vector<8x16x32xf32>, vector<8x16x32xf32>, vector<8x16x32xf32> -> vector<8x16x96xf32>
    %16 = vector.shape_cast %15 : vector<8x16x96xf32> to vector<128x96xf32>
    %17 = arith.truncf %16 : vector<128x96xf32> to vector<128x96xbf16>
    %c0_6 = arith.constant 0 : index
    %c0_7 = arith.constant 0 : index
    %18 = vector.load %arg3[%c0_6, %c0_7] : memref<96x32xbf16, #tpu.memory_space<vmem>>, vector<96x32xbf16>
    %cst_8 = arith.constant dense<0.000000e+00> : vector<128x32xf32>
    %19 = tpu.matmul %17, %18, %cst_8 {dimension_numbers = #tpu.dot_dimension_numbers<[1], [0], [0], [1], [0, 0, 1, 1], [], []>} : vector<128x96xbf16>, vector<96x32xbf16>, vector<128x32xf32> -> vector<128x32xf32>
    %20 = vector.shape_cast %19 : vector<128x32xf32> to vector<8x16x32xf32>
    %cst_9 = arith.constant dense<0xFF800000> : vector<8x32xf32>
    %21 = vector.multi_reduction <maximumf>, %20, %cst_9 [1] : vector<8x16x32xf32> to vector<8x32xf32>
    %c0_10 = arith.constant 0 : index
    %c0_11 = arith.constant 0 : index
    %22 = vector.load %arg4[%c0_10, %c0_11] : memref<1x32xf32, #tpu.memory_space<vmem>>, vector<1x32xf32>
    %23 = vector.broadcast %22 : vector<1x32xf32> to vector<8x32xf32>
    %24 = arith.addf %21, %23 : vector<8x32xf32>
    %25 = math.tanh %24 : vector<8x32xf32>
    %c0_12 = arith.constant 0 : index
    %c0_13 = arith.constant 0 : index
    %26 = vector.load %arg5[%c0_12, %c0_13] : memref<32x32xbf16, #tpu.memory_space<vmem>>, vector<32x32xbf16>
    %27 = arith.extf %26 : vector<32x32xbf16> to vector<32x32xf32>
    %cst_14 = arith.constant dense<0.000000e+00> : vector<8x32xf32>
    %28 = tpu.matmul %25, %27, %cst_14 {dimension_numbers = #tpu.dot_dimension_numbers<[1], [0], [0], [1], [0, 0, 1, 1], [], []>} : vector<8x32xf32>, vector<32x32xf32>, vector<8x32xf32> -> vector<8x32xf32>
    %c0_15 = arith.constant 0 : index
    %c0_16 = arith.constant 0 : index
    %29 = vector.load %arg6[%c0_15, %c0_16] : memref<1x32xf32, #tpu.memory_space<vmem>>, vector<1x32xf32>
    %30 = vector.broadcast %29 : vector<1x32xf32> to vector<8x32xf32>
    %31 = arith.addf %28, %30 : vector<8x32xf32>
    %cst_17 = arith.constant 0.000000e+00 : f32
    %32 = vector.broadcast %cst_17 : f32 to vector<8x32xf32>
    %33 = arith.maximumf %31, %32 : vector<8x32xf32>
    %34 = arith.addf %25, %33 : vector<8x32xf32>
    %c0_18 = arith.constant 0 : index
    %c0_19 = arith.constant 0 : index
    %35 = vector.load %arg7[%c0_18, %c0_19] : memref<8x32xf32, #tpu.memory_space<vmem>>, vector<8x32xf32>
    tpu.vector_store %arg7[%c0_18, %c0_19], %34 {strides = array<i32>} : memref<8x32xf32, #tpu.memory_space<vmem>>, vector<8x32xf32>,
    return
  }
  func.func @transform_0(%arg0: i32) -> (i32, i32, i32) {
    %c0_i32 = arith.constant 0 : i32
    %c0_i32_0 = arith.constant 0 : i32
    %c0_i32_1 = arith.constant 0 : i32
    return %arg0, %c0_i32, %c0_i32_0 : i32, i32, i32
  }
  func.func @transform_1(%arg0: i32) -> (i32, i32) {
    %c0_i32 = arith.constant 0 : i32
    %c0_i32_0 = arith.constant 0 : i32
    %c0_i32_1 = arith.constant 0 : i32
    return %c0_i32, %c0_i32_0 : i32, i32
  }
  func.func @transform_2(%arg0: i32) -> (i32, i32) {
    %c0_i32 = arith.constant 0 : i32
    %c0_i32_0 = arith.constant 0 : i32
    %c0_i32_1 = arith.constant 0 : i32
    return %c0_i32, %c0_i32_0 : i32, i32
  }
  func.func @transform_3(%arg0: i32) -> (i32, i32) {
    %c0_i32 = arith.constant 0 : i32
    %c0_i32_0 = arith.constant 0 : i32
    %c0_i32_1 = arith.constant 0 : i32
    return %c0_i32, %c0_i32_0 : i32, i32
  }
  func.func @transform_4(%arg0: i32) -> (i32, i32) {
    %c0_i32 = arith.constant 0 : i32
    %c0_i32_0 = arith.constant 0 : i32
    %c0_i32_1 = arith.constant 0 : i32
    return %c0_i32, %c0_i32_0 : i32, i32
  }
  func.func @transform_5(%arg0: i32) -> (i32, i32) {
    %c0_i32 = arith.constant 0 : i32
    %c0_i32_0 = arith.constant 0 : i32
    %c0_i32_1 = arith.constant 0 : i32
    return %c0_i32, %c0_i32_0 : i32, i32
  }
  func.func @transform_6(%arg0: i32) -> (i32, i32) {
    %c0_i32 = arith.constant 0 : i32
    %c0_i32_0 = arith.constant 0 : i32
    return %arg0, %c0_i32 : i32, i32
  }
}

</mosaic_0001>

<bundles_post_ra>
// kernel: tpu_custom_call.1
= control target key start
LH: loop header
LB: loop body
LE: loop exit
PB: predicated region body
PF: predicated region fallthrough
CT: control target
= control target key end

     0   :  { %11 = vsyncpa [#allocation3], 0  ;;  %s2222_s0 = inlined_call_operand.vmem [shape: s32[16,24,1], index: 0, kind: input, shape index: {}]   ;;  %s2223_s1 = inlined_call_operand.vmem [shape: bf16[50,32], index: 1, kind: input, shape index: {}]   ;;  %s2224_s2 = inlined_call_operand.vmem [shape: bf16[96,32], index: 2, kind: input, shape index: {}]   ;;  %s2225_s3 = inlined_call_operand.vmem [shape: f32[1,32], index: 3, kind: input, shape index: {}]   ;;  %s2226_s4 = inlined_call_operand.vmem [shape: bf16[32,32], index: 4, kind: input, shape index: {}]   ;;  %s2227_s5 = inlined_call_operand.vmem [shape: f32[1,32], index: 5, kind: input, shape index: {}]   ;;  %s2228_s6 = inlined_call_operand.hbm [shape: f32[16,32], index: 6, kind: output, shape index: {}]  }
   0x1   :  { %13 = vsyncpa [#allocation3 + $0x1], 0  ;;  %s1785_s21 = smov 0   ;;  %s1787_s22 = smov 0  }
   0x2   :  { %s1789_s23 = smov 0   ;;  %s1791_s24 = smov 0  }
   0x3 LB: > { %s1806_s25 = sadd.s32 4294967295, %s1741_s24   ;;  %s1359_s26 = sadd.s32 4294967294, %s1741_s24   ;;  %s1741_s24 = sphi %s1791_s24, %s2234_s24   ;;  %s1737_s23 = sphi %s1789_s23, %s2233_s23   ;;  %s1733_s22 = sphi %s1787_s22, %s2232_s22   ;;  %s1729_s21 = sphi %s1785_s21, %s2231_s21  }
   0x4   : > { %s1810_s27 = sadd.s32 1, %s1741_s24   ;;  %s157_s28 = sadd.s32 1, %s1737_s23 }
   0x5   : > { %s154_s29 = ssub.s32 %s1741_s24, %s1810_s27  ;;  %p167_p0 = scmp.ne.s32.totalorder %s1737_s23, %s1733_s22 }
   0x6   : > { %p155_p1 = scmp.eq.s32.totalorder %s154_s29, 0  ;;  %p168_p2 = scmp.eq.s32.totalorder %s1806_s25, 1 }
   0x7   : > { %p173_p3 = scmp.ne.s32.totalorder %s1733_s22, %s1729_s21  ;;  %p174_p4 = scmp.eq.s32.totalorder %s1359_s26, 1 }
   0x8   : > { %s1821_s30 = scalar_select %p155_p1, %s1737_s23, %s157_s28  }
   0x9   : > { %p1823_p5 = por %p168_p2, %p167_p0  ;;  %p1827_p6 = por %p174_p4, %p173_p3 }
   0xa   : > { %p1362_p7 = scmp.ge.s32.totalorder %s1741_s24, 1  ;;  %p217_p8 = scmp.lt.s32.totalorder %s1741_s24, 3 }
   0xc   : > { %p218_p9 = pnand %p1362_p7, %p217_p8 }
   0xd   : > { %s1364_s9 = sshll.u32 (!%p218_p9), %s1806_s25, 3  ;;  %v1743_v0 = vmov (!%p218_p9), 0   ;;  %v1653_v1 = vld [vmem:[%s2223_s1] sm:$0xff] (!%p218_p9)   ;;  %v1654_v2 = vld [vmem:[%s2223_s1 + $0x8] sm:$0xff] (!%p218_p9)   ;;  %v1655_v9 = vld [vmem:[%s2223_s1 + $0x10] sm:$0xff] (!%p218_p9)   ;;  %vm479_vm0 = vcmask (!%p218_p9), 1040384   ;;  %v280_v30 = vlaneseq (!%p218_p9) }
   0xe   : > { %221 = sbr.rel (%p218_p9) target bundleno = 1037 (0x40d), region = 44  ;;  %1572 = vset.pattern.permute.xlu1 (!%p218_p9), %v1743_v0  ;;  %1571 = vset.pattern.permute.xlu0 (!%p218_p9), %v1743_v0  ;;  %p249_p10 = scmp.lt.s32.totalorder (!%p218_p9), %s1364_s9, 15  ;;  %v1656_v10 = vld [vmem:[%s2223_s1 + $0x18] ss:$0 sps:$4 sm:$0x11] (!%p218_p9)   ;;  %vm442_vm5 = vcmask (!%p218_p9), 408576  }
   0xf   : > { %1447 = vmatprep.subr.bf16.mxu0 (!%p218_p9), %v1653_v1  ;;  %v481_v13 = vsel (!%p218_p9), %vm479_vm0, %v1656_v10, 0  ;;  %v1875_v31 = vand.u32 (!%p218_p9), 127, %v280_v30  ;;  %v1744_v36 = vmov (!%p218_p9), 0.0   ;;  %v1658_v30 = vld [vmem:[%s2224_s2 + $0x8] sm:$0xff] (!%p218_p9)   ;;  %s1745_s19 = smov (!%p218_p9), 32   ;;  %s1746_s20 = smov (!%p218_p9), 64  }
  0x10   : > { %1448 = vmatpush3.bf16.msra.mxu0 (!%p218_p9), %v1653_v1  ;;  %s1400_s16 = sshll.u32 (!%p218_p9), %s1806_s25, 7  ;;  %s1749_s29 = smov (!%p218_p9), [#allocation2]  }
  0x11   : > { %1449 = vmatprep.subr.bf16.mxu0 (!%p218_p9), %v1654_v2  ;;  %s2176_s26 = scalar_lea.hbm (!%p218_p9), %s2228_s6, %s1400_s16 }
  0x14   : > { %1450 = vmatpush3.bf16.msra.mxu0 (!%p218_p9), %v1654_v2 }
  0x15   : > { %s2236_s9 = smov (!%p249_p10, %s1364_s9), 15  ;;  %1451 = vmatprep.subr.bf16.mxu0 %v1655_v9 }
  0x16   : > { %s1525_s14 = smul.u32 24, %s2236_s9  ;;  %s1683_s9 = sshll.u32 %s1749_s29, 4  ;;  %s1684_s9 = int_to_ptr.vmem [resolvable:$false] %s1683_s9 }
  0x17   : > { %s1685_s10 = scalar_lea.vmem %s1684_s9, 256 }
  0x18   : > { %s1843_s17 = scalar_lea.vmem %s2222_s0, %s1525_s14  ;;  %1452 = vmatpush3.bf16.msra.mxu0 %v1655_v9  ;;  %s245_s14 = sand.u32 1, %s1733_s22  }
  0x19   : > { %v258_v3 = vld [vmem:[%s1843_s17 + $0x10] sm:$0xff]  ;;  %v256_v4 = vld [vmem:[%s1843_s17] sm:$0xff]  ;;  %v259_v5 = vld [vmem:[%s1843_s17 + $0x18] sm:$0xff]  ;;  %1524 = vmatprep.subr.msk.bf16.mxu0 %vm479_vm0, %v1656_v10  ;;  %s2163_s15 = sshll.u32 %s245_s14, 3  ;;  %s1287_s25 = scalar_lea.sflag [#allocation3], %s245_s14 }
  0x1a   : > { %289 = vperm.xlu1 %1572, %v258_v3   ;;  %283 = vperm.xlu0 %1571, %v256_v4   ;;  %v257_v6 = vld [vmem:[%s1843_s17 + $0x8] sm:$0xff]  ;;  %v260_v8 = vld [vmem:[%s1843_s17 + $0x20] sm:$0xff]  ;;  %v263_v11 = vld [vmem:[%s1843_s17 + $0x38] sm:$0xff] }
  0x1b   : > { %v261_v7 = vld [vmem:[%s1843_s17 + $0x28] sm:$0xff]  ;;  %v262_v12 = vld [vmem:[%s1843_s17 + $0x30] sm:$0xff]  ;;  %v264_v15 = vld [vmem:[%s1843_s17 + $0x40] sm:$0xff] }
  0x1c   : > { %v265_v14 = vld [vmem:[%s1843_s17 + $0x48] sm:$0xff]  ;;  %1454 = vmatpush3.bf16.msra.mxu0 %v481_v13  ;;  %v267_v16 = vld [vmem:[%s1843_s17 + $0x58] sm:$0xff]  ;;  %v266_v17 = vld [vmem:[%s1843_s17 + $0x50] sm:$0xff] }
  0x1d   : > { %v269_v18 = vld [vmem:[%s1843_s17 + $0x68] sm:$0xff]  ;;  %v268_v19 = vld [vmem:[%s1843_s17 + $0x60] sm:$0xff]  ;;  %v271_v20 = vld [vmem:[%s1843_s17 + $0x78] sm:$0xff] }
  0x1e   : > { %292 = vperm.xlu1 %1572, %v259_v5   ;;  %286 = vperm.xlu0 %1571, %v257_v6   ;;  %v270_v21 = vld [vmem:[%s1843_s17 + $0x70] sm:$0xff]  ;;  %v273_v22 = vld [vmem:[%s1843_s17 + $0x88] sm:$0xff]  ;;  %v272_v23 = vld [vmem:[%s1843_s17 + $0x80] sm:$0xff] }
  0x1f   : > { %v275_v24 = vld [vmem:[%s1843_s17 + $0x98] sm:$0xff]  ;;  %v274_v25 = vld [vmem:[%s1843_s17 + $0x90] sm:$0xff]  ;;  %v277_v26 = vld [vmem:[%s1843_s17 + $0xa8] sm:$0xff] }
  0x20   : > { %v276_v27 = vld [vmem:[%s1843_s17 + $0xa0] sm:$0xff]  ;;  %v279_v28 = vld [vmem:[%s1843_s17 + $0xb8] sm:$0xff]  ;;  %v278_v29 = vld [vmem:[%s1843_s17 + $0xb0] sm:$0xff]  ;;  %s247_s17 = scalar_lea.vmem [#allocation2], %s2163_s15 }
  0x21   : > { %s1300_s18 = sshll.u32 %s247_s17, 4  ;;  %s2178_s18 = int_to_ptr.vmem [resolvable:$true] %s1300_s18 }
  0x22   : > { %298 = vperm.xlu1 %1572, %v261_v7   ;;  %295 = vperm.xlu0 %1571, %v260_v8   ;;  %s1679_s28 = scalar_lea.vmem %s2178_s18, 128  ;;  %p1686_p0 = scmp.lt.s32.totalorder %s2178_s18, %s1684_s9 }
  0x23   : > { %p1680_p11 = scmp.ne.s32.totalorder %s2178_s18, %s1679_s28  ;;  %p1687_p1 = scmp.lt.s32.totalorder %s1685_s10, %s1679_s28 }
  0x25   : > { %p1681_p12 = pnand %p1680_p11, %p1823_p5  ;;  %p1688_p2 = por %p1687_p1, %p1686_p0 }
  0x26   : > { %304 = vperm.xlu1 %1572, %v263_v11   ;;  %301 = vperm.xlu0 %1571, %v262_v12  }
  0x27   : > { %p1682_p13 = pneg %p1681_p12 }
  0x29   : > { %p1689_p3 = pnand %p1688_p2, %p1682_p13 }
  0x2a   : > { %310 = vperm.xlu1 %1572, %v265_v14   ;;  %307 = vperm.xlu0 %1571, %v264_v15  }
  0x2e   : > { %316 = vperm.xlu1 %1572, %v267_v16   ;;  %313 = vperm.xlu0 %1571, %v266_v17  }
  0x32   : > { %322 = vperm.xlu1 %1572, %v269_v18   ;;  %319 = vperm.xlu0 %1571, %v268_v19  }
  0x36   : > { %328 = vperm.xlu1 %1572, %v271_v20   ;;  %325 = vperm.xlu0 %1571, %v270_v21  }
  0x3a   : > { %334 = vperm.xlu1 %1572, %v273_v22   ;;  %331 = vperm.xlu0 %1571, %v272_v23  }
  0x3e   : > { %340 = vperm.xlu1 %1572, %v275_v24   ;;  %337 = vperm.xlu0 %1571, %v274_v25  }
  0x42   : > { %346 = vperm.xlu1 %1572, %v277_v26   ;;  %343 = vperm.xlu0 %1571, %v276_v27  }
  0x46   : > { %352 = vperm.xlu1 %1572, %v279_v28   ;;  %349 = vperm.xlu0 %1571, %v278_v29   ;;  %v1657_v29 = vld [vmem:[%s2224_s2] sm:$0xff]  }
  0x47   : > { %1479 = vmatprep.subr.bf16.mxu1 %v1657_v29 }
  0x48   : > { %1480 = vmatpush3.bf16.msra.mxu1 %v1657_v29 }
  0x49   : > { %1481 = vmatprep.subr.bf16.mxu1 %v1658_v30 }
  0x4c   : > { %1482 = vmatpush3.bf16.msra.mxu1 %v1658_v30 }
  0x99   : > { %v290_v32 = vpop.permute.xlu1 %289  ;;  %v284_v33 = vpop.permute.xlu0 %283 }
  0x9a   : > { %vm356_vm1 = vcmp.eq.s32.totalorder %v290_v32, %v1875_v31  ;;  %vm354_vm2 = vcmp.eq.s32.totalorder %v284_v33, %v1875_v31  ;;  %v1660_v32 = vld [vmem:[%s2224_s2 + $0x18] sm:$0xff]  }
  0x9b   : > { %v380_v37 = vsel %vm356_vm1, 1.0, %v1744_v36  ;;  %v378_v38 = vsel %vm354_vm2, 1.0, %v1744_v36 }
  0x9d   : > { %v293_v34 = vpop.permute.xlu1 %292  ;;  %v287_v35 = vpop.permute.xlu0 %286 }
  0x9e   : > { %vm357_vm3 = vcmp.eq.s32.totalorder %v293_v34, %v1875_v31  ;;  %vm355_vm4 = vcmp.eq.s32.totalorder %v287_v35, %v1875_v31 }
  0x9f   : > { %v381_v39 = vsel %vm357_vm3, 1.0, %v1744_v36  ;;  %v379_v40 = vsel %vm355_vm4, 1.0, %v1744_v36 }
  0xa0   : > { %v403_v41 = vpack.c.bf16 %v381_v39, %v380_v37  ;;  %v402_v42 = vpack.c.bf16 %v379_v40, %v378_v38  ;;  %v1661_v40 = vld [vmem:[%s2224_s2 + $0x20] sm:$0xff]  }
  0xa1   : > { %v299_v43 = vpop.permute.xlu1 %298  ;;  %v296_v44 = vpop.permute.xlu0 %295 }
  0xa2   : > { %vm359_vm6 = vcmp.eq.s32.totalorder %v299_v43, %v1875_v31  ;;  %vm358_vm7 = vcmp.eq.s32.totalorder %v296_v44, %v1875_v31  ;;  %1455 = vmatprep.mubr.msk.bf16.mxu0 %vm442_vm5, %v402_v42 }
  0xa3   : > { %v383_v45 = vsel %vm359_vm6, 1.0, %v1744_v36  ;;  %v382_v46 = vsel %vm358_vm7, 1.0, %v1744_v36  ;;  %1456 = vmatmul.mubr.msk.bf16.vlgmr.msra.gmra.mrb[0].mxu0 %vm442_vm5, %v403_v41 }
  0xa4   : > { %v404_v47 = vpack.c.bf16 %v383_v45, %v382_v46 }
  0xa5   : > { %v305_v48 = vpop.permute.xlu1 %304  ;;  %v302_v49 = vpop.permute.xlu0 %301 }
  0xa6   : > { %vm361_vm8 = vcmp.eq.s32.totalorder %v305_v48, %v1875_v31  ;;  %vm360_vm9 = vcmp.eq.s32.totalorder %v302_v49, %v1875_v31  ;;  %1459 = vmatprep.mubr.msk.bf16.mxu0 %vm442_vm5, %v404_v47 }
  0xa7   : > { %v385_v50 = vsel %vm361_vm8, 1.0, %v1744_v36  ;;  %v384_v51 = vsel %vm360_vm9, 1.0, %v1744_v36 }
  0xa8   : > { %v405_v52 = vpack.c.bf16 %v385_v50, %v384_v51  ;;  %v1662_v51 = vld [vmem:[%s2224_s2 + $0x28] sm:$0xff]  }
  0xa9   : > { %v311_v53 = vpop.permute.xlu1 %310  ;;  %v308_v54 = vpop.permute.xlu0 %307 }
  0xaa   : > { %vm363_vm10 = vcmp.eq.s32.totalorder %v311_v53, %v1875_v31  ;;  %vm362_vm11 = vcmp.eq.s32.totalorder %v308_v54, %v1875_v31 }
  0xab   : > { %v387_v55 = vsel %vm363_vm10, 1.0, %v1744_v36  ;;  %v386_v56 = vsel %vm362_vm11, 1.0, %v1744_v36  ;;  %1460 = vmatmul.mubr.msk.bf16.gmra.mrb[4].mxu0 %vm442_vm5, %v405_v52  ;;  %vm725_vm11 = vcmask 1045504  }
  0xac   : > { %v406_v57 = vpack.c.bf16 %v387_v55, %v386_v56 }
  0xad   : > { %v317_v58 = vpop.permute.xlu1 %316  ;;  %v314_v59 = vpop.permute.xlu0 %313 }
  0xae   : > { %vm365_vm12 = vcmp.eq.s32.totalorder %v317_v58, %v1875_v31  ;;  %vm364_vm13 = vcmp.eq.s32.totalorder %v314_v59, %v1875_v31  ;;  %1463 = vmatprep.mubr.msk.bf16.mxu0 %vm442_vm5, %v406_v57 }
  0xaf   : > { %v389_v60 = vsel %vm365_vm12, 1.0, %v1744_v36  ;;  %v388_v61 = vsel %vm364_vm13, 1.0, %v1744_v36  ;;  %vm814_vm12 = vcmask 261120   ;;  %vm831_vm13 = vcmask 523264  }
  0xb0   : > { %v407_v62 = vpack.c.bf16 %v389_v60, %v388_v61 }
  0xb1   : > { %v323_v63 = vpop.permute.xlu1 %322  ;;  %v320_v0 = vpop.permute.xlu0 %319 }
  0xb2   : > { %vm367_vm14 = vcmp.eq.s32.totalorder %v323_v63, %v1875_v31  ;;  %vm366_vm15 = vcmp.eq.s32.totalorder %v320_v0, %v1875_v31 }
  0xb3   : > { %v391_v1 = vsel %vm367_vm14, 1.0, %v1744_v36  ;;  %v390_v2 = vsel %vm366_vm15, 1.0, %v1744_v36  ;;  %1464 = vmatmul.mubr.msk.bf16.gmra.mrb[8].mxu0 %vm442_vm5, %v407_v62  ;;  %vm904_vm14 = vcmask 785408   ;;  %vm1748_vm15 = vmmov 0  }
  0xb4   : > { %v408_v3 = vpack.c.bf16 %v391_v1, %v390_v2 }
  0xb5   : > { %v329_v4 = vpop.permute.xlu1 %328  ;;  %v326_v5 = vpop.permute.xlu0 %325 }
  0xb6   : > { %vm369_vm0 = vcmp.eq.s32.totalorder %v329_v4, %v1875_v31  ;;  %vm368_vm1 = vcmp.eq.s32.totalorder %v326_v5, %v1875_v31  ;;  %1467 = vmatprep.mubr.msk.bf16.mxu0 %vm442_vm5, %v408_v3 }
  0xb7   : > { %v393_v6 = vsel %vm369_vm0, 1.0, %v1744_v36  ;;  %v392_v7 = vsel %vm368_vm1, 1.0, %v1744_v36  ;;  %vm1145_vm0 = vcmask 1041409   ;;  %vm1148_vm1 = vcmask 1042434  }
  0xb8   : > { %v409_v8 = vpack.c.bf16 %v393_v6, %v392_v7 }
  0xb9   : > { %v335_v9 = vpop.permute.xlu1 %334  ;;  %v332_v10 = vpop.permute.xlu0 %331 }
  0xba   : > { %vm371_vm2 = vcmp.eq.s32.totalorder %v335_v9, %v1875_v31  ;;  %vm370_vm3 = vcmp.eq.s32.totalorder %v332_v10, %v1875_v31 }
  0xbb   : > { %v395_v11 = vsel %vm371_vm2, 1.0, %v1744_v36  ;;  %v394_v12 = vsel %vm370_vm3, 1.0, %v1744_v36  ;;  %1468 = vmatmul.mubr.msk.bf16.gmra.mrb[12].mxu0 %vm442_vm5, %v409_v8  ;;  %vm1151_vm2 = vcmask 1043459   ;;  %vm1154_vm3 = vcmask 1044484  }
  0xbc   : > { %v410_v13 = vpack.c.bf16 %v395_v11, %v394_v12 }
  0xbd   : > { %v341_v14 = vpop.permute.xlu1 %340  ;;  %v338_v15 = vpop.permute.xlu0 %337 }
  0xbe   : > { %vm373_vm4 = vcmp.eq.s32.totalorder %v341_v14, %v1875_v31  ;;  %vm372_vm6 = vcmp.eq.s32.totalorder %v338_v15, %v1875_v31  ;;  %1471 = vmatprep.mubr.msk.bf16.mxu0 %vm442_vm5, %v410_v13 }
  0xbf   : > { %v397_v16 = vsel %vm373_vm4, 1.0, %v1744_v36  ;;  %v396_v17 = vsel %vm372_vm6, 1.0, %v1744_v36  ;;  %vm1157_vm4 = vcmask 1045509   ;;  %vm1160_vm6 = vcmask 1046534  }
  0xc0   : > { %v411_v18 = vpack.c.bf16 %v397_v16, %v396_v17 }
  0xc1   : > { %v347_v19 = vpop.permute.xlu1 %346  ;;  %v344_v20 = vpop.permute.xlu0 %343 }
  0xc2   : > { %vm375_vm7 = vcmp.eq.s32.totalorder %v347_v19, %v1875_v31  ;;  %vm374_vm8 = vcmp.eq.s32.totalorder %v344_v20, %v1875_v31 }
  0xc3   : > { %v399_v21 = vsel %vm375_vm7, 1.0, %v1744_v36  ;;  %v398_v22 = vsel %vm374_vm8, 1.0, %v1744_v36  ;;  %1472 = vmatmul.mubr.msk.bf16.gmra.mrb[16].mxu0 %vm442_vm5, %v411_v18  ;;  %vm1163_vm7 = vcmask 1047559  }
  0xc4   : > { %v412_v23 = vpack.c.bf16 %v399_v21, %v398_v22 }
  0xc5   : > { %v353_v24 = vpop.permute.xlu1 %352  ;;  %v350_v25 = vpop.permute.xlu0 %349 }
  0xc6   : > { %vm377_vm9 = vcmp.eq.s32.totalorder %v353_v24, %v1875_v31  ;;  %vm376_vm10 = vcmp.eq.s32.totalorder %v350_v25, %v1875_v31  ;;  %1475 = vmatprep.mubr.msk.bf16.mxu0 %vm442_vm5, %v412_v23  ;;  %v1659_v31 = vld [vmem:[%s2224_s2 + $0x10] sm:$0xff]  }
  0xc7   : > { %v401_v26 = vsel %vm377_vm9, 1.0, %v1744_v36  ;;  %v400_v27 = vsel %vm376_vm10, 1.0, %v1744_v36  ;;  %1483 = vmatprep.subr.bf16.mxu1 %v1659_v31 }
  0xc8   : > { %v413_v28 = vpack.c.bf16 %v401_v26, %v400_v27  ;;  %1484 = vmatpush3.bf16.msra.mxu1 %v1659_v31 }
  0xc9   : > { %1485 = vmatprep.subr.bf16.mxu1 %v1660_v32 }
  0xcb   : > { %1476 = vmatmul.mubr.msk.bf16.gmra.mrb[20].mxu0 %vm442_vm5, %v413_v28  ;;  %vm636_vm5 = vcmask 1046528  }
  0xcc   : > { %1486 = vmatpush3.bf16.msra.mxu1 %v1660_v32 }
  0xcd   : > { %1487 = vmatprep.subr.bf16.mxu1 %v1661_v40 }
  0xd0   : > { %1488 = vmatpush3.bf16.msra.mxu1 %v1661_v40 }
  0xd1   : > { %1489 = vmatprep.subr.bf16.mxu1 %v1662_v51 }
  0xd4   : > { %1490 = vmatpush3.bf16.msra.mxu1 %v1662_v51 }
 0x176   : > { %v1457_v33 = vpop.f32.mrb[0].mxu0 }
 0x177   : > { %v1949_v34 = vpop.f32.mrb[1].mxu0  ;;  %v640_v37 = vrot.slane %v1457_v33, 1  ;;  %v729_v38 = vrot.slane %v1457_v33, 2 }
 0x178   : > { %v1951_v35 = vpop.f32.mrb[2].mxu0  ;;  %v637_v41 = vrot.slane %v1949_v34, 1  ;;  %v726_v42 = vrot.slane %v1949_v34, 2 }
 0x179   : > { %v1953_v39 = vpop.f32.mrb[3].mxu0  ;;  %v642_v54 = vrot.slane %v1951_v35, 1  ;;  %v731_v55 = vrot.slane %v1951_v35, 2 }
 0x17a   : > { %v638_v43 = vrot.slane %v1953_v39, 1  ;;  %v727_v44 = vrot.slane %v1953_v39, 2 }
 0x17c   : > { %v639_v45 = vsel %vm636_vm5, %v637_v41, %v638_v43  ;;  %v641_v46 = vsel %vm636_vm5, %v638_v43, %v640_v37  ;;  %v728_v47 = vsel %vm725_vm11, %v726_v42, %v727_v44  ;;  %v730_v48 = vsel %vm725_vm11, %v727_v44, %v729_v38 }
 0x17d   : > { %v1573_v49 = vpack.i.bf16 %v641_v46, %v639_v45  ;;  %v1578_v50 = vpack.i.bf16 %v730_v48, %v728_v47 }
 0x17e   : > { %v1969_v52 = vpop.f32.mrb[4].mxu0 }
 0x17f   : > { %1574 = vrot.lane.b32.xlu0 %v1573_v49, %s1745_s19  ;;  %v1972_v53 = vpop.f32.mrb[5].mxu0  ;;  %v647_v59 = vrot.slane %v1969_v52, 1  ;;  %v736_v60 = vrot.slane %v1969_v52, 2 }
 0x180   : > { %v643_v56 = vrot.slane %v1972_v53, 1  ;;  %v732_v57 = vrot.slane %v1972_v53, 2  ;;  %v1978_v58 = vpop.f32.mrb[6].mxu0 }
 0x181   : > { %v648_v61 = vrot.slane %v1978_v58, 1  ;;  %v737_v62 = vrot.slane %v1978_v58, 2  ;;  %v536_v63 = vpop.f32.mrb[7].mxu0 }
 0x182   : > { %v645_v0 = vrot.slane %v536_v63, 1  ;;  %v734_v1 = vrot.slane %v536_v63, 2  ;;  %v644_v2 = vsel %vm636_vm5, %v642_v54, %v643_v56  ;;  %v733_v3 = vsel %vm725_vm11, %v731_v55, %v732_v57 }
 0x183   : > { %1579 = vrot.lane.b32.xlu0 %v1578_v50, %s1746_s20  ;;  %v649_v4 = vsel %vm636_vm5, %v647_v59, %v648_v61  ;;  %v738_v5 = vsel %vm725_vm11, %v736_v60, %v737_v62 }
 0x184   : > { %v646_v6 = vsel %vm636_vm5, %v643_v56, %v645_v0  ;;  %v735_v7 = vsel %vm725_vm11, %v732_v57, %v734_v1 }
 0x185   : > { %v1583_v8 = vpack.i.bf16 %v646_v6, %v644_v2  ;;  %v1588_v9 = vpack.i.bf16 %v735_v7, %v733_v3 }
 0x186   : > { %v1991_v10 = vpop.f32.mrb[8].mxu0 }
 0x187   : > { %1584 = vrot.lane.b32.xlu1 %v1583_v8, %s1745_s19  ;;  %v549_v11 = vpop.f32.mrb[9].mxu0  ;;  %v653_v15 = vrot.slane %v1991_v10, 1  ;;  %v742_v16 = vrot.slane %v1991_v10, 2 }
 0x188   : > { %v650_v12 = vrot.slane %v549_v11, 1  ;;  %v739_v13 = vrot.slane %v549_v11, 2  ;;  %v1466_v14 = vpop.f32.mrb[10].mxu0 }
 0x189   : > { %v655_v17 = vrot.slane %v1466_v14, 1  ;;  %v744_v18 = vrot.slane %v1466_v14, 2  ;;  %v1996_v19 = vpop.f32.mrb[11].mxu0 }
 0x18a   : > { %v652_v20 = vrot.slane %v1996_v19, 1  ;;  %v741_v21 = vrot.slane %v1996_v19, 2  ;;  %v651_v22 = vsel %vm636_vm5, %v648_v61, %v650_v12  ;;  %v740_v23 = vsel %vm725_vm11, %v737_v62, %v739_v13 }
 0x18b   : > { %1589 = vrot.lane.b32.xlu1 %v1588_v9, %s1746_s20  ;;  %v1593_v24 = vpack.i.bf16 %v651_v22, %v649_v4  ;;  %v656_v25 = vsel %vm636_vm5, %v653_v15, %v655_v17  ;;  %v1598_v26 = vpack.i.bf16 %v740_v23, %v738_v5  ;;  %v745_v27 = vsel %vm725_vm11, %v742_v16, %v744_v18 }
 0x18c   : > { %v654_v28 = vsel %vm636_vm5, %v652_v20, %v653_v15  ;;  %v743_v29 = vsel %vm725_vm11, %v741_v21, %v742_v16 }
 0x18d   : > { %1594 = vrot.lane.b32.xlu0 %v1593_v24, %s1745_s19  ;;  %v1603_v30 = vpack.i.bf16 %v656_v25, %v654_v28  ;;  %v1608_v31 = vpack.i.bf16 %v745_v27, %v743_v29 }
 0x18e   : > { %v1469_v32 = vpop.f32.mrb[12].mxu0 }
 0x18f   : > { %1604 = vrot.lane.b32.xlu1 %v1603_v30, %s1745_s19  ;;  %v2009_v33 = vpop.f32.mrb[13].mxu0  ;;  %v660_v38 = vrot.slane %v1469_v32, 1  ;;  %v749_v40 = vrot.slane %v1469_v32, 2 }
 0x190   : > { %v2011_v37 = vpop.f32.mrb[14].mxu0  ;;  %v657_v42 = vrot.slane %v2009_v33, 1  ;;  %v746_v43 = vrot.slane %v2009_v33, 2 }
 0x191   : > { %1599 = vrot.lane.b32.xlu0 %v1598_v26, %s1746_s20  ;;  %v2014_v41 = vpop.f32.mrb[15].mxu0  ;;  %v662_v56 = vrot.slane %v2011_v37, 1  ;;  %v751_v57 = vrot.slane %v2011_v37, 2 }
 0x192   : > { %v658_v44 = vrot.slane %v2014_v41, 1  ;;  %v747_v45 = vrot.slane %v2014_v41, 2 }
 0x193   : > { %1609 = vrot.lane.b32.xlu1 %v1608_v31, %s1746_s20 }
 0x194   : > { %v659_v46 = vsel %vm636_vm5, %v657_v42, %v658_v44  ;;  %v661_v47 = vsel %vm636_vm5, %v658_v44, %v660_v38  ;;  %v748_v48 = vsel %vm725_vm11, %v746_v43, %v747_v45  ;;  %v750_v49 = vsel %vm725_vm11, %v747_v45, %v749_v40 }
 0x195   : > { %v1613_v50 = vpack.i.bf16 %v661_v47, %v659_v46  ;;  %v1618_v51 = vpack.i.bf16 %v750_v49, %v748_v48 }
 0x196   : > { %v2025_v54 = vpop.f32.mrb[16].mxu0 }
 0x197   : > { %1614 = vrot.lane.b32.xlu0 %v1613_v50, %s1745_s19  ;;  %v2028_v55 = vpop.f32.mrb[17].mxu0  ;;  %v667_v62 = vrot.slane %v2025_v54, 1  ;;  %v756_v63 = vrot.slane %v2025_v54, 2 }
 0x198   : > { %v663_v59 = vrot.slane %v2028_v55, 1  ;;  %v752_v60 = vrot.slane %v2028_v55, 2  ;;  %v2034_v61 = vpop.f32.mrb[18].mxu0 }
 0x199   : > { %v668_v0 = vrot.slane %v2034_v61, 1  ;;  %v757_v1 = vrot.slane %v2034_v61, 2  ;;  %v584_v2 = vpop.f32.mrb[19].mxu0 }
 0x19a   : > { %v665_v3 = vrot.slane %v584_v2, 1  ;;  %v754_v4 = vrot.slane %v584_v2, 2  ;;  %v664_v5 = vsel %vm636_vm5, %v662_v56, %v663_v59  ;;  %v753_v6 = vsel %vm725_vm11, %v751_v57, %v752_v60 }
 0x19b   : > { %1619 = vrot.lane.b32.xlu0 %v1618_v51, %s1746_s20  ;;  %v669_v7 = vsel %vm636_vm5, %v667_v62, %v668_v0  ;;  %v758_v8 = vsel %vm725_vm11, %v756_v63, %v757_v1 }
 0x19c   : > { %v666_v9 = vsel %vm636_vm5, %v663_v59, %v665_v3  ;;  %v755_v11 = vsel %vm725_vm11, %v752_v60, %v754_v4 }
 0x19d   : > { %v1623_v12 = vpack.i.bf16 %v666_v9, %v664_v5  ;;  %v1628_v13 = vpack.i.bf16 %v755_v11, %v753_v6 }
 0x19e   : > { %v2047_v14 = vpop.f32.mrb[20].mxu0 }
 0x19f   : > { %1624 = vrot.lane.b32.xlu1 %v1623_v12, %s1745_s19  ;;  %v597_v15 = vpop.f32.mrb[21].mxu0  ;;  %v673_v20 = vrot.slane %v2047_v14, 1  ;;  %v762_v21 = vrot.slane %v2047_v14, 2 }
 0x1a0   : > { %v670_v16 = vrot.slane %v597_v15, 1  ;;  %v759_v17 = vrot.slane %v597_v15, 2  ;;  %v1478_v18 = vpop.f32.mrb[22].mxu0 }
 0x1a1   : > { %v675_v22 = vrot.slane %v1478_v18, 1  ;;  %v764_v23 = vrot.slane %v1478_v18, 2  ;;  %v2052_v24 = vpop.f32.mrb[23].mxu0 }
 0x1a2   : > { %v672_v25 = vrot.slane %v2052_v24, 1  ;;  %v761_v26 = vrot.slane %v2052_v24, 2  ;;  %v671_v27 = vsel %vm636_vm5, %v668_v0, %v670_v16  ;;  %v760_v28 = vsel %vm725_vm11, %v757_v1, %v759_v17 }
 0x1a3   : > { %1629 = vrot.lane.b32.xlu1 %v1628_v13, %s1746_s20  ;;  %v1633_v29 = vpack.i.bf16 %v671_v27, %v669_v7  ;;  %v676_v30 = vsel %vm636_vm5, %v673_v20, %v675_v22  ;;  %v1643_v31 = vpack.i.bf16 %v760_v28, %v758_v8  ;;  %v765_v32 = vsel %vm725_vm11, %v762_v21, %v764_v23 }
 0x1a4   : > { %v674_v38 = vsel %vm636_vm5, %v672_v25, %v673_v20  ;;  %v763_v40 = vsel %vm725_vm11, %v761_v26, %v762_v21 }
 0x1a5   : > { %1634 = vrot.lane.b32.xlu0 %v1633_v29, %s1745_s19  ;;  %v1638_v42 = vpack.i.bf16 %v676_v30, %v674_v38  ;;  %v1648_v43 = vpack.i.bf16 %v765_v32, %v763_v40 }
 0x1a7   : > { %1639 = vrot.lane.b32.xlu1 %v1638_v42, %s1745_s19 }
 0x1a9   : > { %1644 = vrot.lane.b32.xlu0 %v1643_v31, %s1746_s20 }
 0x1ab   : > { %1649 = vrot.lane.b32.xlu1 %v1648_v43, %s1746_s20 }
 0x1f1   : > { %v1575_v44 = vpop.permute.xlu0 %1574 }
 0x1f2   : > { %v1577_v45 = vunpack.i.h.bf16 %v1575_v44  ;;  %v1576_v46 = vunpack.i.l.bf16 %v1575_v44 }
 0x1f4   : > { %v815_v50 = vsel %vm814_vm12, %v1949_v34, %v1576_v46  ;;  %v816_v51 = vsel %vm814_vm12, %v1953_v39, %v1577_v45 }
 0x1f5   : > { %v1580_v47 = vpop.permute.xlu0 %1579 }
 0x1f6   : > { %v1582_v48 = vunpack.i.h.bf16 %v1580_v47  ;;  %v1581_v49 = vunpack.i.l.bf16 %v1580_v47 }
 0x1f8   : > { %v832_v56 = vsel %vm831_vm13, %v815_v50, %v1581_v49  ;;  %v833_v57 = vsel %vm831_vm13, %v816_v51, %v1582_v48 }
 0x1f9   : > { %v1585_v59 = vpop.permute.xlu1 %1584  ;;  %v848_v60 = vpack.c.bf16 %v833_v57, %v832_v56 }
 0x1fa   : > { %v1587_v62 = vunpack.i.h.bf16 %v1585_v59  ;;  %v1586_v63 = vunpack.i.l.bf16 %v1585_v59 }
 0x1fb   : > { %1491 = vmatprep.mubr.msk.bf16.mxu1 %vm904_vm14, %v848_v60 }
 0x1fc   : > { %v818_v34 = vsel %vm814_vm12, %v1972_v53, %v1587_v62  ;;  %v817_v39 = vsel %vm814_vm12, %v1951_v35, %v1586_v63 }
 0x1fd   : > { %v1590_v0 = vpop.permute.xlu1 %1589 }
 0x1fe   : > { %v1592_v1 = vunpack.i.h.bf16 %v1590_v0  ;;  %v1591_v2 = vunpack.i.l.bf16 %v1590_v0 }
 0x1ff   : > { %v1595_v3 = vpop.permute.xlu0 %1594 }
 0x200   : > { %v834_v4 = vsel %vm831_vm13, %v817_v39, %v1591_v2  ;;  %v835_v5 = vsel %vm831_vm13, %v818_v34, %v1592_v1  ;;  %v1597_v7 = vunpack.i.h.bf16 %v1595_v3  ;;  %v1596_v8 = vunpack.i.l.bf16 %v1595_v3 }
 0x201   : > { %v849_v6 = vpack.c.bf16 %v835_v5, %v834_v4  ;;  %v1605_v9 = vpop.permute.xlu1 %1604 }
 0x202   : > { %v1607_v11 = vunpack.i.h.bf16 %v1605_v9  ;;  %v1606_v12 = vunpack.i.l.bf16 %v1605_v9  ;;  %v820_v53 = vsel %vm814_vm12, %v1978_v58, %v1597_v7  ;;  %v819_v35 = vsel %vm814_vm12, %v1969_v52, %v1596_v8 }
 0x203   : > { %v1600_v13 = vpop.permute.xlu0 %1599  ;;  %1492 = vmatmul.mubr.msk.bf16.vlgmr.msra.gmra.mrb[0].mxu1 %vm904_vm14, %v849_v6 }
 0x204   : > { %v1602_v15 = vunpack.i.h.bf16 %v1600_v13  ;;  %v1601_v16 = vunpack.i.l.bf16 %v1600_v13  ;;  %v822_v23 = vsel %vm814_vm12, %v1991_v10, %v1607_v11  ;;  %v821_v25 = vsel %vm814_vm12, %v1996_v19, %v1606_v12 }
 0x205   : > { %v1610_v17 = vpop.permute.xlu1 %1609  ;;  %v1747_v13 = vmov 0.0|0.0  }
 0x206   : > { %v836_v18 = vsel %vm831_vm13, %v819_v35, %v1601_v16  ;;  %v837_v20 = vsel %vm831_vm13, %v820_v53, %v1602_v15  ;;  %v1612_v21 = vunpack.i.h.bf16 %v1610_v17  ;;  %v1611_v22 = vunpack.i.l.bf16 %v1610_v17  ;;  %1518 = vmatprep.subr.bf16.mxu1 %v1747_v13 }
 0x207   : > { %v850_v26 = vpack.c.bf16 %v837_v20, %v836_v18 }
 0x208   : > { %v838_v27 = vsel %vm831_vm13, %v821_v25, %v1611_v22  ;;  %v839_v58 = vsel %vm831_vm13, %v822_v23, %v1612_v21 }
 0x209   : > { %v851_v28 = vpack.c.bf16 %v839_v58, %v838_v27  ;;  %v1615_v52 = vpop.permute.xlu0 %1614  ;;  %1495 = vmatprep.mubr.msk.bf16.mxu1 %vm904_vm14, %v850_v26 }
 0x20a   : > { %v1617_v29 = vunpack.i.h.bf16 %v1615_v52  ;;  %v1616_v30 = vunpack.i.l.bf16 %v1615_v52 }
 0x20b   : > { %1496 = vmatmul.mubr.msk.bf16.gmra.mrb[4].mxu1 %vm904_vm14, %v851_v28 }
 0x20c   : > { %v824_v10 = vsel %vm814_vm12, %v2014_v41, %v1617_v29  ;;  %v823_v19 = vsel %vm814_vm12, %v2009_v33, %v1616_v30 }
 0x20d   : > { %v1620_v31 = vpop.permute.xlu0 %1619 }
 0x20e   : > { %v1622_v32 = vunpack.i.h.bf16 %v1620_v31  ;;  %v1621_v38 = vunpack.i.l.bf16 %v1620_v31 }
 0x210   : > { %v840_v40 = vsel %vm831_vm13, %v823_v19, %v1621_v38  ;;  %v841_v42 = vsel %vm831_vm13, %v824_v10, %v1622_v32 }
 0x211   : > { %v852_v43 = vpack.c.bf16 %v841_v42, %v840_v40  ;;  %v1625_v44 = vpop.permute.xlu1 %1624 }
 0x212   : > { %v1627_v45 = vunpack.i.h.bf16 %v1625_v44  ;;  %v1626_v46 = vunpack.i.l.bf16 %v1625_v44 }
 0x213   : > { %1499 = vmatprep.mubr.msk.bf16.mxu1 %vm904_vm14, %v852_v43 }
 0x214   : > { %v826_v50 = vsel %vm814_vm12, %v2028_v55, %v1627_v45  ;;  %v825_v41 = vsel %vm814_vm12, %v2011_v37, %v1626_v46 }
 0x215   : > { %v1630_v47 = vpop.permute.xlu1 %1629 }
 0x216   : > { %v1632_v48 = vunpack.i.h.bf16 %v1630_v47  ;;  %v1631_v49 = vunpack.i.l.bf16 %v1630_v47 }
 0x217   : > { %v1635_v33 = vpop.permute.xlu0 %1634 }
 0x218   : > { %v842_v51 = vsel %vm831_vm13, %v825_v41, %v1631_v49  ;;  %v843_v56 = vsel %vm831_vm13, %v826_v50, %v1632_v48  ;;  %v1637_v59 = vunpack.i.h.bf16 %v1635_v33  ;;  %v1636_v60 = vunpack.i.l.bf16 %v1635_v33 }
 0x219   : > { %v853_v57 = vpack.c.bf16 %v843_v56, %v842_v51  ;;  %v1640_v62 = vpop.permute.xlu1 %1639 }
 0x21a   : > { %v1642_v63 = vunpack.i.h.bf16 %v1640_v62  ;;  %v1641_v0 = vunpack.i.l.bf16 %v1640_v62  ;;  %v828_v55 = vsel %vm814_vm12, %v2034_v61, %v1637_v59  ;;  %v827_v37 = vsel %vm814_vm12, %v2025_v54, %v1636_v60  ;;  %v1404_v54 = vld [vmem:[%s2226_s4] sm:$0xff]  }
 0x21b   : > { %v1645_v1 = vpop.permute.xlu0 %1644  ;;  %1500 = vmatmul.mubr.msk.bf16.gmra.mrb[8].mxu1 %vm904_vm14, %v853_v57 }
 0x21c   : > { %v1647_v2 = vunpack.i.h.bf16 %v1645_v1  ;;  %v1646_v34 = vunpack.i.l.bf16 %v1645_v1  ;;  %v830_v7 = vsel %vm814_vm12, %v2047_v14, %v1642_v63  ;;  %v829_v8 = vsel %vm814_vm12, %v2052_v24, %v1641_v0  ;;  %1520 = vmatpush3.bf16.msra.mxu1 %v1404_v54  ;;  %v1411_v14 = vld [vmem:[%s2226_s4 + $0x8] sm:$0xff]  }
 0x21d   : > { %v1650_v39 = vpop.permute.xlu1 %1649  ;;  %1521 = vmatprep.subr.bf16.mxu1 %v1747_v13 }
 0x21e   : > { %v844_v3 = vsel %vm831_vm13, %v827_v37, %v1646_v34  ;;  %v845_v4 = vsel %vm831_vm13, %v828_v55, %v1647_v2  ;;  %v1652_v5 = vunpack.i.h.bf16 %v1650_v39  ;;  %v1651_v6 = vunpack.i.l.bf16 %v1650_v39 }
 0x21f   : > { %v854_v9 = vpack.c.bf16 %v845_v4, %v844_v3  ;;  %v1396_v4 = vld [vmem:[%s2225_s3] ss:$0 sm:$0xff] }
 0x220   : > { %v846_v11 = vsel %vm831_vm13, %v829_v8, %v1651_v6  ;;  %v847_v61 = vsel %vm831_vm13, %v830_v7, %v1652_v5  ;;  %1523 = vmatpush3.bf16.msra.mxu1 %v1411_v14 }
 0x221   : > { %v855_v12 = vpack.c.bf16 %v847_v61, %v846_v11  ;;  %1503 = vmatprep.mubr.msk.bf16.mxu1 %vm904_vm14, %v854_v9 }
 0x223   : > { %1504 = vmatmul.mubr.msk.bf16.gmra.mrb[12].mxu1 %vm904_vm14, %v855_v12 }
 0x224   : > { %1515 = vmatprep.mubr.msk.f32.mxu1 %vm1748_vm15, %v1744_v36 }
 0x2d6   : > { %v1493_v24 = vpop.f32.mrb[0].mxu1 }
 0x2d7   : > { %v963_v15 = vpop.f32.mrb[1].mxu1  ;;  %v1035_v53 = vsel %vm814_vm12, %v1493_v24, -inf }
 0x2d8   : > { %v1494_v16 = vpop.f32.mrb[2].mxu1  ;;  %v1026_v18 = vsel %vm814_vm12, %v963_v15, -inf }
 0x2d9   : > { %v1036_v35 = vsel %vm814_vm12, %v1494_v16, -inf  ;;  %v966_v17 = vpop.f32.mrb[3].mxu1 }
 0x2da   : > { %v1037_v20 = vmax.f32 %v1035_v53, %v1036_v35  ;;  %v1027_v36 = vsel %vm814_vm12, %v966_v17, -inf }
 0x2db   : > { %v1028_v21 = vmax.f32 %v1026_v18, %v1027_v36 }
 0x2dc   : > { %v1038_v26 = vrot.slane %v1037_v20, 4 }
 0x2dd   : > { %v1029_v32 = vrot.slane %v1028_v21, 4 }
 0x2de   : > { %v1497_v22 = vpop.f32.mrb[4].mxu1  ;;  %v1039_v38 = vmax.f32 %v1037_v20, %v1038_v26 }
 0x2df   : > { %v979_v23 = vpop.f32.mrb[5].mxu1  ;;  %v1053_v27 = vsel %vm814_vm12, %v1497_v22, -inf  ;;  %v1030_v40 = vmax.f32 %v1028_v21, %v1029_v32 }
 0x2e0   : > { %v1498_v25 = vpop.f32.mrb[6].mxu1  ;;  %v1044_v52 = vsel %vm814_vm12, %v979_v23, -inf  ;;  %v1040_v43 = vrot.slane %v1039_v38, 2 }
 0x2e1   : > { %v1054_v58 = vsel %vm814_vm12, %v1498_v25, -inf  ;;  %v982_v28 = vpop.f32.mrb[7].mxu1  ;;  %v1031_v45 = vrot.slane %v1030_v40, 2 }
 0x2e2   : > { %v1055_v29 = vmax.f32 %v1053_v27, %v1054_v58  ;;  %v1045_v30 = vsel %vm814_vm12, %v982_v28, -inf  ;;  %v1041_v47 = vmax.f32 %v1039_v38, %v1040_v43 }
 0x2e3   : > { %v1046_v31 = vmax.f32 %v1044_v52, %v1045_v30  ;;  %v1032_v41 = vmax.f32 %v1030_v40, %v1031_v45 }
 0x2e4   : > { %v1056_v42 = vrot.slane %v1055_v29, 4  ;;  %v1042_v56 = vrot.slane %v1041_v47, 1 }
 0x2e5   : > { %v1047_v10 = vrot.slane %v1046_v31, 4  ;;  %v1033_v34 = vrot.slane %v1032_v41, 1 }
 0x2e6   : > { %v1057_v46 = vmax.f32 %v1055_v29, %v1056_v42  ;;  %v1043_v39 = vmax.f32 %v1041_v47, %v1042_v56 }
 0x2e7   : > { %v1048_v19 = vmax.f32 %v1046_v31, %v1047_v10  ;;  %v1034_v11 = vmax.f32 %v1032_v41, %v1033_v34 }
 0x2e8   : > { %v1058_v33 = vrot.slane %v1057_v46, 2  ;;  %v1106_v13 = vadd.f32 %v1396_v4, %v1043_v39 }
 0x2e9   : > { %v1049_v44 = vrot.slane %v1048_v19, 2  ;;  %v1105_v58 = vadd.f32 %v1396_v4, %v1034_v11 }
 0x2ea   : > { %v1059_v55 = vmax.f32 %v1057_v46, %v1058_v33  ;;  %1663 = vtanh.f32 %v1106_v13 }
 0x2eb   : > { %v1050_v49 = vmax.f32 %v1048_v19, %v1049_v44 }
 0x2ec   : > { %v1060_v61 = vrot.slane %v1059_v55, 1 }
 0x2ed   : > { %v1051_v1 = vrot.slane %v1050_v49, 1 }
 0x2ee   : > { %v1501_v48 = vpop.f32.mrb[8].mxu1  ;;  %v1061_v22 = vmax.f32 %v1059_v55, %v1060_v61 }
 0x2ef   : > { %v995_v50 = vpop.f32.mrb[9].mxu1  ;;  %v1071_v57 = vsel %vm814_vm12, %v1501_v48, -inf  ;;  %v1052_v7 = vmax.f32 %v1050_v49, %v1051_v1 }
 0x2f0   : > { %v1502_v51 = vpop.f32.mrb[10].mxu1  ;;  %v1062_v62 = vsel %vm814_vm12, %v995_v50, -inf  ;;  %v1108_v30 = vadd.f32 %v1396_v4, %v1061_v22 }
 0x2f1   : > { %v1072_v59 = vsel %vm814_vm12, %v1502_v51, -inf  ;;  %v998_v60 = vpop.f32.mrb[11].mxu1  ;;  %v1107_v20 = vadd.f32 %v1396_v4, %v1052_v7  ;;  %v1397_v7 = vld [vmem:[%s2227_s5] ss:$0 sm:$0xff] }
 0x2f2   : > { %v1073_v63 = vmax.f32 %v1071_v57, %v1072_v59  ;;  %v1063_v0 = vsel %vm814_vm12, %v998_v60, -inf }
 0x2f3   : > { %v1064_v2 = vmax.f32 %v1062_v62, %v1063_v0  ;;  %1665 = vtanh.f32 %v1107_v20 }
 0x2f4   : > { %v1074_v37 = vrot.slane %v1073_v63, 4  ;;  %1667 = vtanh.f32 %v1105_v58  ;;  %v1664_v47 = vpop.eup %1663 }
 0x2f5   : > { %v1065_v3 = vrot.slane %v1064_v2, 4  ;;  %v1144_v41 = vrot.slane %v1664_v47, 7 }
 0x2f6   : > { %v1075_v5 = vmax.f32 %v1073_v63, %v1074_v37  ;;  %v1505_v6 = vpop.f32.mrb[12].mxu1 }
 0x2f7   : > { %v1066_v8 = vmax.f32 %v1064_v2, %v1065_v3  ;;  %v1011_v9 = vpop.f32.mrb[13].mxu1  ;;  %v1089_v24 = vsel %vm814_vm12, %v1505_v6, -inf }
 0x2f8   : > { %v1076_v12 = vrot.slane %v1075_v5, 2  ;;  %v1506_v54 = vpop.f32.mrb[14].mxu1  ;;  %v1080_v35 = vsel %vm814_vm12, %v1011_v9, -inf }
 0x2f9   : > { %v1067_v14 = vrot.slane %v1066_v8, 2  ;;  %v1090_v15 = vsel %vm814_vm12, %v1506_v54, -inf  ;;  %v1014_v16 = vpop.f32.mrb[15].mxu1 }
 0x2fa   : > { %v1077_v53 = vmax.f32 %v1075_v5, %v1076_v12  ;;  %v1091_v17 = vmax.f32 %v1089_v24, %v1090_v15  ;;  %v1081_v18 = vsel %vm814_vm12, %v1014_v16, -inf }
 0x2fb   : > { %v1068_v36 = vmax.f32 %v1066_v8, %v1067_v14  ;;  %v1082_v21 = vmax.f32 %v1080_v35, %v1081_v18 }
 0x2fc   : > { %v1078_v23 = vrot.slane %v1077_v53, 1  ;;  %v1092_v25 = vrot.slane %v1091_v17, 4 }
 0x2fd   : > { %v1069_v26 = vrot.slane %v1068_v36, 1  ;;  %v1083_v27 = vrot.slane %v1082_v21, 4  ;;  %v1666_v49 = vpop.eup %1665 }
 0x2fe   : > { %v1093_v28 = vmax.f32 %v1091_v17, %v1092_v25  ;;  %v1079_v31 = vmax.f32 %v1077_v53, %v1078_v23  ;;  %v1668_v33 = vpop.eup %1667  ;;  %v1147_v51 = vrot.slane %v1666_v49, 6 }
 0x2ff   : > { %v1070_v52 = vmax.f32 %v1068_v36, %v1069_v26  ;;  %v1084_v29 = vmax.f32 %v1082_v21, %v1083_v27  ;;  %v1146_v59 = vsel %vm1145_vm0, %v1144_v41, %v1668_v33 }
 0x300   : > { %v1094_v32 = vrot.slane %v1093_v28, 2  ;;  %v1110_v42 = vadd.f32 %v1396_v4, %v1079_v31  ;;  %v1149_v60 = vsel %vm1148_vm1, %v1147_v51, %v1146_v59 }
 0x301   : > { %v1109_v38 = vadd.f32 %v1396_v4, %v1070_v52  ;;  %v1085_v10 = vrot.slane %v1084_v29, 2 }
 0x302   : > { %v1095_v19 = vmax.f32 %v1093_v28, %v1094_v32 }
 0x303   : > { %1669 = vtanh.f32 %v1109_v38  ;;  %v1086_v40 = vmax.f32 %v1084_v29, %v1085_v10 }
 0x304   : > { %1671 = vtanh.f32 %v1108_v30  ;;  %v1096_v43 = vrot.slane %v1095_v19, 1 }
 0x305   : > { %v1087_v44 = vrot.slane %v1086_v40, 1  ;;  %1673 = vtanh.f32 %v1110_v42 }
 0x306   : > { %v1097_v45 = vmax.f32 %v1095_v19, %v1096_v43 }
 0x307   : > { %v1088_v46 = vmax.f32 %v1086_v40, %v1087_v44 }
 0x308   : > { %v1112_v48 = vadd.f32 %v1396_v4, %v1097_v45 }
 0x309   : > { %v1111_v50 = vadd.f32 %v1396_v4, %v1088_v46 }
 0x30a   : > { %1675 = vtanh.f32 %v1112_v48 }
 0x30b   : > { %1677 = vtanh.f32 %v1111_v50 }
 0x30d   : > { %v1670_v56 = vpop.eup %1669 }
 0x30e   : > { %v1672_v57 = vpop.eup %1671  ;;  %v1153_v62 = vrot.slane %v1670_v56, 4 }
 0x30f   : > { %v1150_v63 = vrot.slane %v1672_v57, 5  ;;  %v1674_v0 = vpop.eup %1673 }
 0x310   : > { %v1156_v37 = vrot.slane %v1674_v0, 3 }
 0x311   : > { %v1152_v1 = vsel %vm1151_vm2, %v1150_v63, %v1149_v60 }
 0x312   : > { %v1155_v34 = vsel %vm1154_vm3, %v1153_v62, %v1152_v1 }
 0x313   : > { %v1158_v3 = vsel %vm1157_vm4, %v1156_v37, %v1155_v34 }
 0x314   : > { %v1676_v2 = vpop.eup %1675 }
 0x315   : > { %v1678_v55 = vpop.eup %1677  ;;  %v1162_v4 = vrot.slane %v1676_v2, 1 }
 0x316   : > { %v1159_v39 = vrot.slane %v1678_v55, 2 }
 0x318   : > { %v1161_v5 = vsel %vm1160_vm6, %v1159_v39, %v1158_v3 }
 0x319   : > { %v1164_v6 = vsel %vm1163_vm7, %v1162_v4, %v1161_v5 }
 0x31a   : > { %1516 = vmatmul.mubr.msk.f32.vlgmr.msra.gmra.mrb[16].mxu1 %vm814_vm12, %v1164_v6 }
 0x3ed   : > { %v1233_v8 = vpop.f32.mrb[16].mxu1 }
 0x3ee   : > { %v1234_v9 = vadd.f32 %v1397_v7, %v1233_v8  ;;  %v1517_v11 = vpop.f32.mrb[17].mxu1 }
 0x3f0   : > { %v1237_v61 = vmax.f32 %v1234_v9, 0.0 }
 0x3f2   : > { %v1239_v12 = vrot.slane %v1237_v61, 1  ;;  %v1240_v54 = vrot.slane %v1237_v61, 2  ;;  %v1241_v13 = vrot.slane %v1237_v61, 3  ;;  %v1242_v14 = vrot.slane %v1237_v61, 4 }
 0x3f3   : > { %v1243_v24 = vrot.slane %v1237_v61, 5  ;;  %v1244_v15 = vrot.slane %v1237_v61, 6  ;;  %v1245_v16 = vrot.slane %v1237_v61, 7  ;;  %v1254_v20 = vadd.f32 %v1668_v33, %v1237_v61 }
 0x3f4   : > { %v1255_v53 = vadd.f32 %v1664_v47, %v1239_v12  ;;  %v1256_v35 = vadd.f32 %v1666_v49, %v1240_v54  ;;  %v1257_v17 = vadd.f32 %v1672_v57, %v1241_v13  ;;  %v1258_v18 = vadd.f32 %v1670_v56, %v1242_v14 }
 0x3f5   : > { %v1259_v36 = vadd.f32 %v1674_v0, %v1243_v24  ;;  %v1260_v23 = vadd.f32 %v1678_v55, %v1244_v15  ;;  %v1261_v25 = vadd.f32 %v1676_v2, %v1245_v16 }
 0x3f6   : > { %v1270_v21 = vrot.slane %v1255_v53, 7  ;;  %v1272_v22 = vrot.slane %v1256_v35, 6  ;;  %v1274_v27 = vrot.slane %v1257_v17, 5  ;;  %v1276_v28 = vrot.slane %v1258_v18, 4 }
 0x3f7   : > { %v1278_v29 = vrot.slane %v1259_v36, 3  ;;  %v1280_v31 = vrot.slane %v1260_v23, 2  ;;  %v1282_v38 = vrot.slane %v1261_v25, 1 }
 0x3f8   : > { %v1271_v26 = vsel %vm1145_vm0, %v1270_v21, %v1254_v20 }
 0x3f9   : > { %v1273_v58 = vsel %vm1148_vm1, %v1272_v22, %v1271_v26 }
 0x3fa   : > { %v1275_v52 = vsel %vm1151_vm2, %v1274_v27, %v1273_v58 }
 0x3fb   : > { %v1277_v30 = vsel %vm1154_vm3, %v1276_v28, %v1275_v52 }
 0x3fc   : > { %v1279_v32 = vsel %vm1157_vm4, %v1278_v29, %v1277_v30 }
 0x3fd   : > { %v1281_v10 = vsel %vm1160_vm6, %v1280_v31, %v1279_v32 }
 0x3fe   : > { %v1283_v19 = vsel %vm1163_vm7, %v1282_v38, %v1281_v10 }
 0x3ff   : > { %1285 = vst.msk [vmem:[%s247_s17] sm:$0xff] %vm814_vm12, %v1283_v19 }
 0x400   : > { %1692 = shalt.err (!%p1689_p3)
}
 0x401   : > { %s1693_s11 = scalar_lea.hbm %s2176_s26, 128  ;;  %s1697_s14 = scalar_lea.hbm %s2228_s6, 256 }
 0x402   : > { %p1694_p4 = scmp.ne.s32.totalorder %s2176_s26, %s1693_s11  ;;  %p1698_p9 = scmp.lt.u32.totalorder %s2176_s26, %s2228_s6 }
 0x403   : > { %p1699_p10 = scmp.lt.u32.totalorder %s1697_s14, %s1693_s11  ;;  %p1701_p12 = scmp.lt.u32.totalorder %s1693_s11, %s2176_s26 }
 0x404   : > { %p1695_p7 = pnand %p1694_p4, %p1823_p5 }
 0x405   : > { %p1700_p11 = por %p1699_p10, %p1698_p9 }
 0x406   : > { %p1696_p8 = pneg %p1695_p7 }
 0x407   : > { %p1702_p13 = por %p1701_p12, %p1700_p11 }
 0x409   : > { %p1703_p0 = pnand %p1702_p13, %p1696_p8 }
 0x40b   : > { %1706 = shalt.err (!%p1703_p0)
}
 0x40c   : > { %1526 = dma.vmem_to_hbm [thread:$0]  (%p1823_p5), %s2178_s18, 128, %s2176_s26, %s1287_s25  }
 0x40d PF: > { %p1532_p1 = scmp.ge.s32.totalorder %s1741_s24, 2  ;;  %s1312_s17 = sand.u32 1, %s1729_s21  }
 0x40e   : > { %s1313_s19 = scalar_lea.sflag [#allocation3], %s1312_s17 }
 0x40f   : > { %p1529_p2 = pnand %p1532_p1, %p1827_p6 }
 0x411   : > { %1724 = dma.done.wait (!%p1529_p2), %s1313_s19, 128  }
 0x412   : > { %1726 = vsyncadd (!%p1529_p2), %s1313_s19, 4294967168  ;;  %p16_p3 = scmp.ge.s32.totalorder %s1810_s27, 4   ;;  %s2231_s21 = smov %s1733_s22 }
 0x413   : > { %s2232_s22 = smov %s1737_s23  ;;  %s2233_s23 = smov %s1821_s30 }
 0x414   : > { %s2234_s24 = smov %s1810_s27  ;;  %18 = sbr.rel (!%p16_p3) target bundleno = 3 (0x3), region = 79 }
 0x41b   :  { %1318 = vsyncpa [#allocation3], 1 }
 0x41c   :  { %1320 = vsyncpa [#allocation3 + $0x1], 1 }

</bundles_post_ra>
